<compile_context>
chip_gen: v6e
topology: v6e:2x2x1
jax: 0.10.0
libtpu: 0.0.40
codegen_flags: <defaults>
</compile_context>

<pallas_src>
import dataclasses
import functools

import jax
import jax.numpy as jnp
from jax.experimental import pallas as pl
from jax.experimental.pallas import tpu as pltpu


def _round_up(x: int, m: int) -> int:
    return ((x + m - 1) // m) * m


def _physical_vmem_bytes() -> int:
    try:
        return int(pltpu.get_tpu_info().vmem_capacity_bytes)
    except Exception:
        return 64 << 20  # conservative fallback: v7x per-TensorCore VMEM


def _default_tanh_dtype(compute_dtype):
    """bf16 tanh on v6e/v7x (bf16 EUP); f32 tanh on v5e and older."""
    if jnp.dtype(compute_dtype) != jnp.dtype(jnp.bfloat16):
        return jnp.float32
    try:
        kind = jax.devices()[0].device_kind.lower()
    except Exception:
        kind = ""
    if any(g in kind for g in ("v2", "v3", "v4", "v5")):
        return jnp.float32
    return jnp.bfloat16


@jax.tree_util.register_pytree_node_class
@dataclasses.dataclass(frozen=True)
class HeadParams:
    """Padded (and optionally bf16-cast) head parameters, prepared once."""
    w1: jax.Array   # (d_in_p, d_inner_p)   compute dtype
    b1: jax.Array   # (1, d_inner_p)        float32
    w2: jax.Array   # (d_inner_p, n_cls_p)  compute dtype
    b2: jax.Array   # (1, n_cls_p)          float32
    input_dim: int
    num_classes: int

    def tree_flatten(self):
        return (self.w1, self.b1, self.w2, self.b2), (self.input_dim, self.num_classes)

    @classmethod
    def tree_unflatten(cls, aux, children):
        return cls(*children, *aux)


def prepare_head_params(w_dense, b_dense, w_out, b_out, *, mxu_dtype=None) -> HeadParams:
    """One-time parameter prep (call at init, NOT per forward call).

    Zero-pads the contraction/lane dims up to multiples of 128 (exact) and
    casts the weight matrices to the MXU compute dtype.

    w_dense: (input_dim, inner_dim)   == torch dense.weight.T
    w_out:   (inner_dim, num_classes) == torch out_proj.weight.T
    mxu_dtype: e.g. jnp.bfloat16 -- recommended on v5e/v6e/v7x (the MXU is
      natively bf16; f32 matmuls cost ~3x on v5e).  Biases stay f32.
    """
    d_in, d_inner = w_dense.shape
    d_inner2, n_cls = w_out.shape
    assert d_inner == d_inner2, (w_dense.shape, w_out.shape)

    d_in_p = _round_up(d_in, 128)
    d_inner_p = _round_up(d_inner, 128)
    n_cls_p = _round_up(n_cls, 128)

    wdt = jnp.dtype(mxu_dtype) if mxu_dtype is not None else jnp.dtype(w_dense.dtype)

    w1 = jnp.pad(w_dense, ((0, d_in_p - d_in), (0, d_inner_p - d_inner))).astype(wdt)
    w2 = jnp.pad(w_out, ((0, d_inner_p - d_inner), (0, n_cls_p - n_cls))).astype(wdt)
    b1 = jnp.pad(jnp.reshape(b_dense, (1, -1)).astype(jnp.float32),
                 ((0, 0), (0, d_inner_p - d_inner)))
    b2 = jnp.pad(jnp.reshape(b_out, (1, -1)).astype(jnp.float32),
                 ((0, 0), (0, n_cls_p - n_cls)))
    return HeadParams(w1, b1, w2, b2, int(d_in), int(n_cls))


def _head_kernel(x_ref, w1_ref, b1_ref, w2_ref, b2_ref, o_ref, *,
                 compute_dtype, tanh_dtype):
    # pooler dropout == identity at inference (eval mode / p == 0).
    x = x_ref[...].astype(compute_dtype)        # activations only; weights pre-cast
    # dense: (TB, d_in_p) @ (d_in_p, d_inner_p) -> f32 MXU accumulator.
    h = jnp.dot(x, w1_ref[...], preferred_element_type=jnp.float32)
    h = h + b1_ref[...]                         # f32 bias add, once per output tile
    h = jnp.tanh(h.astype(tanh_dtype))          # EUP; bf16 on v6e/v7x, f32 on v5e
    # out_proj: (TB, d_inner_p) @ (d_inner_p, n_cls_p) -> f32 MXU accumulator.
    out = jnp.dot(h.astype(compute_dtype), w2_ref[...],
                  preferred_element_type=jnp.float32)
    out = out + b2_ref[...]
    o_ref[...] = out.astype(o_ref.dtype)


def bart_classification_head(hidden_states, params: HeadParams, *,
                             block_b=None, tanh_dtype=None,
                             single_buffer_weights=None):
    """Fused classification head: out_proj(tanh(dense(hidden_states))).

    hidden_states: (..., input_dim); returns (..., num_classes) in input dtype.
    `params` comes from prepare_head_params (padding/casting done once there).
    """
    d_in_p, d_inner_p = params.w1.shape
    n_cls_p = params.w2.shape[1]
    d_in, n_cls = params.input_dim, params.num_classes
    assert hidden_states.shape[-1] == d_in, (hidden_states.shape, d_in)

    lead = hidden_states.shape[:-1]
    x = hidden_states.reshape(-1, d_in)
    b_rows = x.shape[0]
    out_dtype = hidden_states.dtype
    compute_dtype = jnp.dtype(params.w1.dtype)

    if tanh_dtype is None:
        tanh_dtype = _default_tanh_dtype(compute_dtype)

    # Only the contraction axis of x needs zero padding (exact); the batch axis
    # stays ragged and is masked by Pallas.  For real BART heads
    # (input_dim = 768 / 1024) this pad is a no-op.
    if d_in_p != d_in:
        x = jnp.pad(x, ((0, 0), (0, d_in_p - d_in)))

    # ---- resident-operand footprint / buffering ----------------------------
    w_bytes = (params.w1.size * params.w1.dtype.itemsize
               + params.w2.size * params.w2.dtype.itemsize
               + params.b1.size * params.b1.dtype.itemsize
               + params.b2.size * params.b2.dtype.itemsize)
    if single_buffer_weights is None:
        # Single-buffer the grid-invariant weights once the default double
        # buffer would waste meaningful VMEM (matters most on v7x's 64 MiB).
        single_buffer_weights = (2 * w_bytes) > (8 << 20)
    wbuf = 1 if single_buffer_weights else 2

    # ---- batch tile ---------------------------------------------------------
    sublane = 16 if (compute_dtype == jnp.bfloat16 or out_dtype == jnp.bfloat16) else 8
    if block_b is None:
        # Target >= 4 grid steps (2 per v7x TensorCore on the "parallel" axis,
        # and >= 2 per core so x/out DMAs pipeline behind compute), cap at 512.
        block_b = min(512, max(sublane, _round_up(pl.cdiv(b_rows, 4), sublane)))
    block_b = max(sublane, _round_up(int(block_b), sublane))
    block_b = min(block_b, _round_up(b_rows, sublane))

    x_item = jnp.dtype(x.dtype).itemsize
    out_item = jnp.dtype(out_dtype).itemsize

    def _vmem_est(bb):
        return (2 * bb * d_in_p * x_item          # double-buffered x tiles
                + 2 * bb * n_cls_p * out_item     # double-buffered out tiles
                + wbuf * w_bytes                  # resident weights / biases
                + 4 * bb * d_inner_p              # f32 intermediate
                + (4 << 20))                      # headroom

    vmem_budget = int(0.9 * _physical_vmem_bytes())
    while _vmem_est(block_b) > vmem_budget and block_b > sublane:
        block_b = max(sublane, _round_up(block_b // 2, sublane))
    # TODO(synk): if the weights alone exceed the VMEM budget (e.g. a >4k-wide
    # head on v7x), switch to a K-tiled grid ("arbitrary" last axis) with an
    # f32 VMEM accumulator instead of keeping w1 fully resident.
    vmem_limit = int(min(max(_vmem_est(block_b), 32 << 20), vmem_budget))

    grid = (pl.cdiv(b_rows, block_b),)
    w_kwargs = dict(pipeline_mode=pl.Buffered(1)) if single_buffer_weights else {}

    out = pl.pallas_call(
        functools.partial(_head_kernel, compute_dtype=compute_dtype,
                          tanh_dtype=jnp.dtype(tanh_dtype)),
        out_shape=jax.ShapeDtypeStruct((b_rows, n_cls_p), out_dtype),
        grid_spec=pltpu.PrefetchScalarGridSpec(
            num_scalar_prefetch=0,
            grid=grid,
            in_specs=[
                pl.BlockSpec((block_b, d_in_p), lambda i: (i, 0)),            # x tile
                pl.BlockSpec((d_in_p, d_inner_p), lambda i: (0, 0), **w_kwargs),
                pl.BlockSpec((1, d_inner_p), lambda i: (0, 0), **w_kwargs),
                pl.BlockSpec((d_inner_p, n_cls_p), lambda i: (0, 0), **w_kwargs),
                pl.BlockSpec((1, n_cls_p), lambda i: (0, 0), **w_kwargs),
            ],
            out_specs=pl.BlockSpec((block_b, n_cls_p), lambda i: (i, 0)),
        ),
        compiler_params=pltpu.CompilerParams(
            dimension_semantics=("parallel",),
            vmem_limit_bytes=vmem_limit,
        ),
    )(x, params.w1, params.b1, params.w2, params.b2)

    # Only the (tiny) padded class columns are sliced off; no batch copy.
    return out[:, :n_cls].reshape(*lead, n_cls)


if __name__ == "__main__":
    batch = 8
    input_dim = 32
    inner_dim = 64
    num_classes = 8
    # pooler_dropout acts as identity at inference (eval mode / p == 0).
    # TODO(synk): training-mode dropout (stochastic masking via pltpu.prng_*)
    # is not implemented; forward here matches inference semantics.

    key = jax.random.PRNGKey(0)
    k_x, k_w1, k_b1, k_w2, k_b2, k_x2 = jax.random.split(key, 6)

    x = jax.random.normal(k_x, (batch, input_dim), dtype=jnp.float32)
    # nn.Linear(input_dim, inner_dim): torch weight is (inner, input); stored
    # transposed here as (input_dim, inner_dim) so the kernel computes x @ W + b.
    w_dense = jax.random.normal(k_w1, (input_dim, inner_dim), jnp.float32) * 0.02
    b_dense = jax.random.normal(k_b1, (inner_dim,), jnp.float32) * 0.02
    w_out = jax.random.normal(k_w2, (inner_dim, num_classes), jnp.float32) * 0.02
    b_out = jax.random.normal(k_b2, (num_classes,), jnp.float32) * 0.02

    def ref_fn(a):
        return jnp.tanh(a @ w_dense + b_dense[None, :]) @ w_out + b_out[None, :]

    # f32 path (exact numerics).  Parameter prep is hoisted (done once).
    params_f32 = prepare_head_params(w_dense, b_dense, w_out, b_out)
    out = jax.block_until_ready(bart_classification_head(x, params_f32))
    assert out.shape == (batch, num_classes)
    assert jnp.allclose(out, ref_fn(x), atol=1e-5, rtol=1e-5)

    # Ragged-batch path (B not a multiple of the block): exercises the masked
    # last block -- no batch padding / output row copy in the wrapper.
    x2 = jax.random.normal(k_x2, (20, input_dim), dtype=jnp.float32)
    out2 = jax.block_until_ready(
        bart_classification_head(x2, params_f32, block_b=8))
    assert out2.shape == (20, num_classes)
    assert jnp.allclose(out2, ref_fn(x2), atol=1e-5, rtol=1e-5)

    # bf16-MXU path (recommended on v5e/v6e/v7x): bf16 operands pre-cast at
    # prep time, f32 accumulation + f32 bias adds; tanh auto-selects bf16
    # (v6e/v7x) or f32 (v5e and older).
    params_bf16 = prepare_head_params(w_dense, b_dense, w_out, b_out,
                                      mxu_dtype=jnp.bfloat16)
    out_bf16 = jax.block_until_ready(bart_classification_head(x, params_bf16))
    assert out_bf16.shape == (batch, num_classes)
    assert jnp.allclose(out_bf16, ref_fn(x), atol=5e-2, rtol=5e-2)

    print("KERNEL_OK")
</pallas_src>

<mosaic_0001>
module attributes {stable_mosaic.version = 11 : i64} {
  func.func @_head_kernel(%arg0: i32, %arg1: memref<8x128xf32, #tpu.memory_space<vmem>>, %arg2: memref<128x128xf32, #tpu.memory_space<vmem>>, %arg3: memref<1x128xf32, #tpu.memory_space<vmem>>, %arg4: memref<128x128xf32, #tpu.memory_space<vmem>>, %arg5: memref<1x128xf32, #tpu.memory_space<vmem>>, %arg6: memref<8x128xf32, #tpu.memory_space<vmem>>) attributes {dimension_semantics = [#tpu.dimension_semantics<parallel>], iteration_bounds = array<i64: 1>, scalar_prefetch = 0 : i64, scratch_operands = 0 : i64, tpu.core_type = #tpu.core_type<tc>, window_params = [{transform_indices = @transform_0, window_bounds = array<i64: 8, 128>}, {pipeline_mode = #tpu.pipeline_mode<synchronous>, transform_indices = @transform_1, window_bounds = array<i64: 128, 128>}, {pipeline_mode = #tpu.pipeline_mode<synchronous>, transform_indices = @transform_2, window_bounds = array<i64: 1, 128>}, {pipeline_mode = #tpu.pipeline_mode<synchronous>, transform_indices = @transform_3, window_bounds = array<i64: 128, 128>}, {pipeline_mode = #tpu.pipeline_mode<synchronous>, transform_indices = @transform_4, window_bounds = array<i64: 1, 128>}, {transform_indices = @transform_5, window_bounds = array<i64: 8, 128>}]} {
    %c0 = arith.constant 0 : index
    %c0_0 = arith.constant 0 : index
    %0 = vector.load %arg1[%c0, %c0_0] : memref<8x128xf32, #tpu.memory_space<vmem>>, vector<8x128xf32>
    %c0_1 = arith.constant 0 : index
    %c0_2 = arith.constant 0 : index
    %1 = vector.load %arg2[%c0_1, %c0_2] : memref<128x128xf32, #tpu.memory_space<vmem>>, vector<128x128xf32>
    %cst = arith.constant dense<0.000000e+00> : vector<8x128xf32>
    %2 = tpu.matmul %0, %1, %cst {dimension_numbers = #tpu.dot_dimension_numbers<[1], [0], [0], [1], [0, 0, 1, 1], [], []>} : vector<8x128xf32>, vector<128x128xf32>, vector<8x128xf32> -> vector<8x128xf32>
    %c0_3 = arith.constant 0 : index
    %c0_4 = arith.constant 0 : index
    %3 = vector.load %arg3[%c0_3, %c0_4] : memref<1x128xf32, #tpu.memory_space<vmem>>, vector<1x128xf32>
    %4 = vector.broadcast %3 : vector<1x128xf32> to vector<8x128xf32>
    %5 = arith.addf %2, %4 : vector<8x128xf32>
    %6 = math.tanh %5 : vector<8x128xf32>
    %c0_5 = arith.constant 0 : index
    %c0_6 = arith.constant 0 : index
    %7 = vector.load %arg4[%c0_5, %c0_6] : memref<128x128xf32, #tpu.memory_space<vmem>>, vector<128x128xf32>
    %cst_7 = arith.constant dense<0.000000e+00> : vector<8x128xf32>
    %8 = tpu.matmul %6, %7, %cst_7 {dimension_numbers = #tpu.dot_dimension_numbers<[1], [0], [0], [1], [0, 0, 1, 1], [], []>} : vector<8x128xf32>, vector<128x128xf32>, vector<8x128xf32> -> vector<8x128xf32>
    %c0_8 = arith.constant 0 : index
    %c0_9 = arith.constant 0 : index
    %9 = vector.load %arg5[%c0_8, %c0_9] : memref<1x128xf32, #tpu.memory_space<vmem>>, vector<1x128xf32>
    %10 = vector.broadcast %9 : vector<1x128xf32> to vector<8x128xf32>
    %11 = arith.addf %8, %10 : vector<8x128xf32>
    %c0_10 = arith.constant 0 : index
    %c0_11 = arith.constant 0 : index
    %12 = vector.load %arg6[%c0_10, %c0_11] : memref<8x128xf32, #tpu.memory_space<vmem>>, vector<8x128xf32>
    tpu.vector_store %arg6[%c0_10, %c0_11], %11 {strides = array<i32>} : memref<8x128xf32, #tpu.memory_space<vmem>>, vector<8x128xf32>,
    return
  }
  func.func @transform_0(%arg0: i32) -> (i32, i32) {
    %c0_i32 = arith.constant 0 : i32
    %c0_i32_0 = arith.constant 0 : i32
    return %arg0, %c0_i32 : i32, i32
  }
  func.func @transform_1(%arg0: i32) -> (i32, i32) {
    %c0_i32 = arith.constant 0 : i32
    %c0_i32_0 = arith.constant 0 : i32
    %c0_i32_1 = arith.constant 0 : i32
    return %c0_i32, %c0_i32_0 : i32, i32
  }
  func.func @transform_2(%arg0: i32) -> (i32, i32) {
    %c0_i32 = arith.constant 0 : i32
    %c0_i32_0 = arith.constant 0 : i32
    %c0_i32_1 = arith.constant 0 : i32
    return %c0_i32, %c0_i32_0 : i32, i32
  }
  func.func @transform_3(%arg0: i32) -> (i32, i32) {
    %c0_i32 = arith.constant 0 : i32
    %c0_i32_0 = arith.constant 0 : i32
    %c0_i32_1 = arith.constant 0 : i32
    return %c0_i32, %c0_i32_0 : i32, i32
  }
  func.func @transform_4(%arg0: i32) -> (i32, i32) {
    %c0_i32 = arith.constant 0 : i32
    %c0_i32_0 = arith.constant 0 : i32
    %c0_i32_1 = arith.constant 0 : i32
    return %c0_i32, %c0_i32_0 : i32, i32
  }
  func.func @transform_5(%arg0: i32) -> (i32, i32) {
    %c0_i32 = arith.constant 0 : i32
    %c0_i32_0 = arith.constant 0 : i32
    return %arg0, %c0_i32 : i32, i32
  }
}

</mosaic_0001>

<bundles_post_ra>
// kernel: tpu_custom_call.1
= control target key start
LH: loop header
LB: loop body
LE: loop exit
PB: predicated region body
PF: predicated region fallthrough
CT: control target
= control target key end

     0   :  { %10 = vsyncpa [#allocation3], 0  ;;  %s557_s0 = inlined_call_operand.hbm [shape: f32[8,128], index: 0, kind: input, shape index: {}]   ;;  %s558_s1 = inlined_call_operand.hbm [shape: f32[128,128], index: 1, kind: input, shape index: {}]   ;;  %s559_s2 = inlined_call_operand.vmem [shape: f32[1,128], index: 2, kind: input, shape index: {}]   ;;  %s560_s3 = inlined_call_operand.hbm [shape: f32[128,128], index: 3, kind: input, shape index: {}]   ;;  %s561_s4 = inlined_call_operand.vmem [shape: f32[1,128], index: 4, kind: input, shape index: {}]   ;;  %s562_s5 = inlined_call_operand.hbm [shape: f32[8,128], index: 5, kind: output, shape index: {}]  }
   0x1   :  { %11 = vsyncpa [#allocation6], 0 }
   0x2   :  { %12 = vsyncpa [#allocation4], 0  ;;  %s467_s18 = smov [#allocation5]  }
   0x3   :  { %s28_s19 = sshll.u32 %s467_s18, 4  ;;  %s29_s19 = int_to_ptr.vmem [resolvable:$true] %s28_s19 }
   0x4   :  { %s389_s20 = scalar_lea.vmem %s29_s19, 2048  ;;  %p394_p1 = scmp.lt.s32.totalorder %s29_s19, %s29_s19 }
   0x5   :  { %p390_p0 = scmp.ne.s32.totalorder %s29_s19, %s389_s20  ;;  %p395_p2 = scmp.lt.s32.totalorder %s389_s20, %s389_s20 }
   0x7   :  { %p396_p3 = por %p395_p2, %p394_p1 }
   0x9   :  { %p397_p4 = pnand %p396_p3, %p390_p0 }
   0xb   :  { %400 = shalt.err (!%p397_p4)
}
   0xc   :  { %s468_s21 = smov 128   ;;  %s469_s22 = smov 8  }
   0xd   :  { %34 = dma.hbm_to_vmem [thread:$0]  %s558_s1, 2048, %s29_s19, [#allocation6], %s468_s21, %s468_s21, %s469_s22  }
   0xe   :  { %s470_s25 = smov [#allocation2]   ;;  %s471_s27 = smov [#allocation7]  }
   0xf   :  { %s19_s26 = sshll.u32 %s470_s25, 4  ;;  %s42_s28 = sshll.u32 %s471_s27, 4  ;;  %s20_s26 = int_to_ptr.vmem [resolvable:$true] %s19_s26  ;;  %s43_s28 = int_to_ptr.vmem [resolvable:$true] %s42_s28 }
  0x10   :  { %s409_s29 = scalar_lea.vmem %s20_s26, 128  ;;  %p414_p6 = scmp.lt.s32.totalorder %s20_s26, %s20_s26 }
  0x11   :  { %p410_p5 = scmp.ne.s32.totalorder %s20_s26, %s409_s29  ;;  %p415_p7 = scmp.lt.s32.totalorder %s409_s29, %s409_s29 }
  0x13   :  { %p416_p8 = por %p415_p7, %p414_p6 }
  0x15   :  { %p417_p9 = pnand %p416_p8, %p410_p5 }
  0x17   :  { %420 = shalt.err (!%p417_p9)
}
  0x18   :  { %22 = dma.hbm_to_vmem [thread:$0]  %s557_s0, 128, %s20_s26, [#allocation3]  }
  0x19   :  { %s429_s7 = scalar_lea.vmem %s43_s28, 2048  ;;  %p434_p11 = scmp.lt.s32.totalorder %s43_s28, %s43_s28 }
  0x1a   :  { %p430_p10 = scmp.ne.s32.totalorder %s43_s28, %s429_s7  ;;  %p435_p12 = scmp.lt.s32.totalorder %s429_s7, %s429_s7 }
  0x1c   :  { %p436_p13 = por %p435_p12, %p434_p11 }
  0x1e   :  { %p437_p0 = pnand %p436_p13, %p430_p10 }
  0x20   :  { %440 = shalt.err (!%p437_p0)
}
  0x21   :  { %48 = dma.hbm_to_vmem [thread:$0]  %s560_s3, 2048, %s43_s28, [#allocation6], %s468_s21, %s468_s21, %s469_s22  }
  0x22   :  { %461 = dma.done.wait [#allocation3], 128  }
  0x23   :  { %462 = vsyncadd [#allocation3], 4294967168 }
  0x24   :  { %463 = dma.done.wait [#allocation6], 4096  }
  0x25   :  { %464 = vsyncadd [#allocation6], 4294963200  ;;  %v472_v0 = vmov 0.0   ;;  %vm473_vm0 = vmmov 0   ;;  %v76_v1 = vld [vmem:[#allocation5 + $0x78] sm:$0xff]  ;;  %v75_v2 = vld [vmem:[#allocation5 + $0x70] sm:$0xff] }
  0x26   :  { %301 = vmatprep.subr.mxu0 %v472_v0  ;;  %333 = vmatprep.mubr.msk.f32.mxu0 %vm473_vm0, %v472_v0  ;;  %v74_v3 = vld [vmem:[#allocation5 + $0x68] sm:$0xff]  ;;  %v73_v4 = vld [vmem:[#allocation5 + $0x60] sm:$0xff]  ;;  %v170_v5 = vld [vmem:[#allocation7 + $0x78] sm:$0xff]  ;;  %s474_s11 = smov [#allocation8]  }
  0x27   :  { %336 = vmatprep.subr.mxu1 %v472_v0  ;;  %368 = vmatprep.mubr.msk.f32.mxu1 %vm473_vm0, %v472_v0  ;;  %v72_v6 = vld [vmem:[#allocation5 + $0x58] sm:$0xff]  ;;  %v169_v7 = vld [vmem:[#allocation7 + $0x70] sm:$0xff]  ;;  %v168_v8 = vld [vmem:[#allocation7 + $0x68] sm:$0xff]  ;;  %s255_s12 = sshll.u32 %s474_s11, 4  ;;  %s256_s12 = int_to_ptr.vmem [resolvable:$true] %s255_s12 }
  0x28   :  { %302 = vmatpush3.msra.mxu0 %v76_v1  ;;  %337 = vmatpush3.msra.mxu1 %v170_v5  ;;  %v71_v9 = vld [vmem:[#allocation5 + $0x50] sm:$0xff]  ;;  %v167_v10 = vld [vmem:[#allocation7 + $0x60] sm:$0xff]  ;;  %v70_v11 = vld [vmem:[#allocation5 + $0x48] sm:$0xff]  ;;  %s441_s13 = scalar_lea.vmem %s256_s12, 128  ;;  %p446_p2 = scmp.lt.s32.totalorder %s256_s12, %s256_s12 }
  0x29   :  { %303 = vmatprep.subr.mxu0 %v472_v0  ;;  %338 = vmatprep.subr.mxu1 %v472_v0  ;;  %v166_v12 = vld [vmem:[#allocation7 + $0x58] sm:$0xff]  ;;  %v69_v13 = vld [vmem:[#allocation5 + $0x40] sm:$0xff]  ;;  %v165_v14 = vld [vmem:[#allocation7 + $0x50] sm:$0xff]  ;;  %p442_p1 = scmp.ne.s32.totalorder %s256_s12, %s441_s13  ;;  %p447_p3 = scmp.lt.s32.totalorder %s441_s13, %s441_s13 }
  0x2a   :  { %304 = vmatpush3.msra.mxu0 %v75_v2  ;;  %339 = vmatpush3.msra.mxu1 %v169_v7  ;;  %v68_v15 = vld [vmem:[#allocation5 + $0x38] sm:$0xff]  ;;  %v164_v16 = vld [vmem:[#allocation7 + $0x48] sm:$0xff]  ;;  %v67_v17 = vld [vmem:[#allocation5 + $0x30] sm:$0xff] }
  0x2b   :  { %305 = vmatprep.subr.mxu0 %v472_v0  ;;  %340 = vmatprep.subr.mxu1 %v472_v0  ;;  %v66_v18 = vld [vmem:[#allocation5 + $0x28] sm:$0xff]  ;;  %v65_v19 = vld [vmem:[#allocation5 + $0x20] sm:$0xff]  ;;  %v64_v20 = vld [vmem:[#allocation5 + $0x18] sm:$0xff]  ;;  %p448_p4 = por %p447_p3, %p446_p2 }
  0x2c   :  { %306 = vmatpush3.msra.mxu0 %v74_v3  ;;  %341 = vmatpush3.msra.mxu1 %v168_v8  ;;  %v63_v21 = vld [vmem:[#allocation5 + $0x10] sm:$0xff]  ;;  %v62_v22 = vld [vmem:[#allocation5 + $0x8] sm:$0xff]  ;;  %v61_v23 = vld [vmem:[#allocation5] sm:$0xff] }
  0x2d   :  { %307 = vmatprep.subr.mxu0 %v472_v0  ;;  %342 = vmatprep.subr.mxu1 %v472_v0  ;;  %v60_v24 = vld [vmem:[#allocation2] sm:$0xff]  ;;  %v163_v25 = vld [vmem:[#allocation7 + $0x40] sm:$0xff]  ;;  %v161_v27 = vld [vmem:[#allocation7 + $0x30] sm:$0xff]  ;;  %p449_p5 = pnand %p448_p4, %p442_p1 }
  0x2e   :  { %308 = vmatpush3.msra.mxu0 %v73_v4  ;;  %343 = vmatpush3.msra.mxu1 %v167_v10  ;;  %v162_v26 = vld [vmem:[#allocation7 + $0x38] sm:$0xff]  ;;  %v160_v28 = vld [vmem:[#allocation7 + $0x28] sm:$0xff]  ;;  %v159_v29 = vld [vmem:[#allocation7 + $0x20] sm:$0xff] }
  0x2f   :  { %309 = vmatprep.subr.mxu0 %v472_v0  ;;  %344 = vmatprep.subr.mxu1 %v472_v0  ;;  %v158_v30 = vld [vmem:[#allocation7 + $0x18] sm:$0xff]  ;;  %v157_v31 = vld [vmem:[#allocation7 + $0x10] sm:$0xff]  ;;  %v156_v32 = vld [vmem:[#allocation7 + $0x8] sm:$0xff] }
  0x30   :  { %310 = vmatpush3.msra.mxu0 %v72_v6  ;;  %345 = vmatpush3.msra.mxu1 %v166_v12  ;;  %v155_v33 = vld [vmem:[#allocation7] sm:$0xff]  ;;  %v265_v34 = vld [vmem:[%s559_s2] ss:$0 sm:$0xff] }
  0x31   :  { %311 = vmatprep.subr.mxu0 %v472_v0  ;;  %346 = vmatprep.subr.mxu1 %v472_v0  ;;  %v266_v39 = vld [vmem:[%s561_s4] ss:$0 sm:$0xff] }
  0x32   :  { %312 = vmatpush3.msra.mxu0 %v71_v9  ;;  %347 = vmatpush3.msra.mxu1 %v165_v14 }
  0x33   :  { %313 = vmatprep.subr.mxu0 %v472_v0  ;;  %348 = vmatprep.subr.mxu1 %v472_v0 }
  0x34   :  { %314 = vmatpush3.msra.mxu0 %v70_v11  ;;  %349 = vmatpush3.msra.mxu1 %v164_v16 }
  0x35   :  { %315 = vmatprep.subr.mxu0 %v472_v0  ;;  %350 = vmatprep.subr.mxu1 %v472_v0 }
  0x36   :  { %316 = vmatpush3.msra.mxu0 %v69_v13  ;;  %351 = vmatpush3.msra.mxu1 %v163_v25 }
  0x37   :  { %317 = vmatprep.subr.mxu0 %v472_v0  ;;  %352 = vmatprep.subr.mxu1 %v472_v0 }
  0x38   :  { %318 = vmatpush3.msra.mxu0 %v68_v15  ;;  %353 = vmatpush3.msra.mxu1 %v162_v26 }
  0x39   :  { %319 = vmatprep.subr.mxu0 %v472_v0  ;;  %354 = vmatprep.subr.mxu1 %v472_v0 }
  0x3a   :  { %320 = vmatpush3.msra.mxu0 %v67_v17  ;;  %355 = vmatpush3.msra.mxu1 %v161_v27 }
  0x3b   :  { %321 = vmatprep.subr.mxu0 %v472_v0  ;;  %356 = vmatprep.subr.mxu1 %v472_v0 }
  0x3c   :  { %322 = vmatpush3.msra.mxu0 %v66_v18  ;;  %357 = vmatpush3.msra.mxu1 %v160_v28 }
  0x3d   :  { %323 = vmatprep.subr.mxu0 %v472_v0  ;;  %358 = vmatprep.subr.mxu1 %v472_v0 }
  0x3e   :  { %324 = vmatpush3.msra.mxu0 %v65_v19  ;;  %359 = vmatpush3.msra.mxu1 %v159_v29 }
  0x3f   :  { %325 = vmatprep.subr.mxu0 %v472_v0  ;;  %360 = vmatprep.subr.mxu1 %v472_v0 }
  0x40   :  { %326 = vmatpush3.msra.mxu0 %v64_v20  ;;  %361 = vmatpush3.msra.mxu1 %v158_v30 }
  0x41   :  { %327 = vmatprep.subr.mxu0 %v472_v0  ;;  %362 = vmatprep.subr.mxu1 %v472_v0 }
  0x42   :  { %328 = vmatpush3.msra.mxu0 %v63_v21  ;;  %363 = vmatpush3.msra.mxu1 %v157_v31 }
  0x43   :  { %329 = vmatprep.subr.mxu0 %v472_v0  ;;  %364 = vmatprep.subr.mxu1 %v472_v0 }
  0x44   :  { %330 = vmatpush3.msra.mxu0 %v62_v22  ;;  %365 = vmatpush3.msra.mxu1 %v156_v32 }
  0x45   :  { %331 = vmatprep.subr.mxu0 %v472_v0  ;;  %366 = vmatprep.subr.mxu1 %v472_v0 }
  0x46   :  { %332 = vmatpush3.msra.mxu0 %v61_v23  ;;  %367 = vmatpush3.msra.mxu1 %v155_v33 }
  0x47   :  { %334 = vmatmul.mubr.f32.vlgmr.msra.gmra.mxu0 %v60_v24 }
 0x107   :  { %v150_v35 = vpop.f32.mrf.mxu0 }
 0x108   :  { %v151_v36 = vadd.f32 %v265_v34, %v150_v35 }
 0x109   :  { %v335_v37 = vpop.f32.mrf.mxu0 }
 0x10a   :  { %379 = vtanh.f32 %v151_v36 }
 0x117   :  { %v380_v38 = vpop.eup %379 }
 0x118   :  { %369 = vmatmul.mubr.f32.vlgmr.msra.gmra.mxu1 %v380_v38 }
 0x1d8   :  { %v244_v40 = vpop.f32.mrf.mxu1 }
 0x1d9   :  { %v245_v41 = vadd.f32 %v266_v39, %v244_v40 }
 0x1da   :  { %v370_v42 = vpop.f32.mrf.mxu1 }
 0x1db   :  { %248 = vst [vmem:[#allocation8] sm:$0xff] %v245_v41 }
 0x1dc   :  { %452 = shalt.err (!%p449_p5)
}
 0x1dd   :  { %258 = dma.vmem_to_hbm [thread:$0]  %s256_s12, 128, %s562_s5, [#allocation4]  }
 0x1de   :  { %465 = dma.done.wait [#allocation4], 128  }
 0x1df   :  { %466 = vsyncadd [#allocation4], 4294967168 }
 0x1e0   :  { %262 = vsyncpa [#allocation3], 1 }
 0x1e1   :  { %263 = vsyncpa [#allocation6], 1 }
 0x1e2   :  { %264 = vsyncpa [#allocation4], 1 }

</bundles_post_ra>
